<compile_context>
chip_gen: v5e
topology: v5e:2x2
jax: 0.10.0
libtpu: 0.0.40
codegen_flags: <defaults>
</compile_context>

<pallas_src>
import functools

import jax
import jax.numpy as jnp
from jax.experimental import pallas as pl
from jax.experimental.pallas import tpu as pltpu


def _round_up(x, m):
    return (x + m - 1) // m * m


@functools.lru_cache(maxsize=None)
def _tpu_plan():
    """Generation-aware defaults: (tm, hn, vmem_budget_bytes)."""
    kind = ""
    try:
        kind = jax.devices()[0].device_kind.lower()
    except Exception:
        pass
    vmem = None
    try:
        vmem = int(pltpu.get_tpu_info().vmem_capacity_bytes)
    except Exception:
        vmem = None
    if vmem is None:
        if "v7" in kind:
            vmem = 64 << 20
        elif kind:
            vmem = 128 << 20
        else:
            vmem = 64 << 20                      # unknown backend: conservative
    if "v7" in kind:
        tm, hn = 384, 512      # compute-bound past tm~320; plan fits 64 MiB VMEM
    elif "v6" in kind or "trillium" in kind or "v5p" in kind:
        tm, hn = 768, 512      # DMA/compute crossover ~650 rows on v6e
    else:
        tm, hn = 256, 512      # v5e crossover ~230 rows; bigger tiles don't help
    budget = min(vmem - (8 << 20), vmem * 7 // 8)   # ~112 MiB (v5e/v6e), ~56 MiB (v7x)
    return tm, hn, int(budget)


def _ffn_kernel(x_ref, w13_ref, w2_ref, o_ref, acc_ref):
    # x_ref:   (tm, Dp)
    # w13_ref: (Dp, 2*hn)   -- [:, :hn] = w1 block, [:, hn:] = w3 block
    # w2_ref:  (hn, Dp)
    # o_ref:   (tm, Dp)
    # acc_ref: (tm, Dp) f32 accumulator, persistent across the hidden axis
    hn = w13_ref.shape[1] // 2

    @pl.when(pl.program_id(1) == 0)
    def _init():
        acc_ref[...] = jnp.zeros_like(acc_ref)

    x = x_ref[...]
    if x.dtype != w13_ref.dtype:              # cast in-kernel (no wrapper HBM pass)
        x = x.astype(w13_ref.dtype)
    # One wide MXU pass produces both the gate (w1) and up (w3) halves.
    h13 = jnp.dot(x, w13_ref[...], preferred_element_type=jnp.float32)
    h1 = h13[:, :hn]
    h3 = h13[:, hn:]
    # SwiGLU gate in f32 (VPU/EUP); keep elementwise math f32 for v5e too.
    gated = (h1 * jax.nn.sigmoid(h1)) * h3
    # Down-projection, accumulate partial sums over hidden blocks in f32.
    acc_ref[...] += jnp.dot(gated.astype(w2_ref.dtype), w2_ref[...],
                            preferred_element_type=jnp.float32)

    @pl.when(pl.program_id(1) == pl.num_programs(1) - 1)
    def _store():
        o_ref[...] = acc_ref[...].astype(o_ref.dtype)


def prepare_weights(w1, w2, w3, *, hn=None, compute_dtype=None):
    """One-time weight preparation (NOT in the per-call hot path).

    w1, w3: (H, D) torch nn.Linear layout; w2: (D, H).
    compute_dtype: recommended jnp.bfloat16 in production (halves weight DMA
      and doubles MXU rate, especially important on v5e); f32 gate math and
      f32 accumulation are kept inside the kernel either way.
    Returns:
      w13: (hb, Dp, 2*hn)  block-interleaved fused gate/up weight
      w2t: (Hp, Dp)        transposed, padded down-projection weight
    """
    H, D = w1.shape
    dtype = compute_dtype if compute_dtype is not None else w1.dtype
    if hn is None:
        hn = _tpu_plan()[1]
    hn = _round_up(int(hn), 128)              # keep the h13 split lane-aligned
    Dp = _round_up(D, 128)
    hn_eff = min(hn, _round_up(H, 128))
    Hp = _round_up(H, hn_eff)
    hb = Hp // hn_eff

    def pad_t(w):  # (H, D) -> padded (Dp, Hp) transpose
        return jnp.zeros((Dp, Hp), dtype).at[:D, :H].set(w.T.astype(dtype))

    w1_t = pad_t(w1)
    w3_t = pad_t(w3)
    # Block h of the fused weight holds [w1_t block | w3_t block] side by side.
    w13 = jnp.concatenate(
        [w1_t.reshape(Dp, hb, hn_eff).transpose(1, 0, 2),
         w3_t.reshape(Dp, hb, hn_eff).transpose(1, 0, 2)],
        axis=2)  # (hb, Dp, 2*hn)
    w2t = jnp.zeros((Hp, Dp), dtype).at[:H, :D].set(w2.T.astype(dtype))
    return w13, w2t


@functools.partial(jax.jit, static_argnames=("tm", "w13_buffers"))
def feed_forward(x, w13, w2t, *, tm=None, w13_buffers=2):
    """x: (B, S, D).  w13/w2t: outputs of prepare_weights()."""
    B, S, D = x.shape
    hb, Dp, two_hn = w13.shape
    hn = two_hn // 2
    Hp = w2t.shape[0]
    assert Hp == hb * hn

    plan_tm, _, budget = _tpu_plan()
    if tm is None:
        tm = plan_tm

    M = B * S
    tm_eff = min(tm, _round_up(M, 8))

    xb = jnp.dtype(x.dtype).itemsize
    wb = jnp.dtype(w13.dtype).itemsize
    ob = jnp.dtype(x.dtype).itemsize

    def _vmem_est(t):
        # Double-buffered blocks + persistent f32 accumulator + f32 intermediates.
        return (2 * (t * Dp * xb            # x blocks
                     + Dp * two_hn * wb     # fused w1/w3 blocks
                     + hn * Dp * wb         # w2 blocks
                     + t * Dp * ob)         # output blocks
                + t * Dp * 4                # f32 accumulator scratch
                + 2 * t * two_hn * 4)       # h13 / gate intermediates

    # Shrink the M tile if the requested plan would not fit this generation's
    # VMEM budget (keeps a few MiB for Mosaic internal scratch).
    while tm_eff > 64 and _vmem_est(tm_eff) + (4 << 20) > budget:
        tm_eff = max(64, _round_up(tm_eff // 2, 8))

    Mp = _round_up(M, tm_eff)
    needs_pad = (Mp != M) or (Dp != D)

    xm = x.reshape(M, D)
    if needs_pad:
        xm = jnp.zeros((Mp, Dp), xm.dtype).at[:M, :D].set(xm)

    grid = (Mp // tm_eff, hb)

    vmem_limit = int(min(max(_vmem_est(tm_eff) + (4 << 20), 32 << 20), budget))

    # Optional deeper buffering of the large fused-weight blocks (v6e only,
    # once the 64 MiB cap is lifted); default 2 keeps the standard pipeline.
    if w13_buffers > 2 and hb > 2:
        w13_spec = pl.BlockSpec((None, Dp, two_hn), lambda i, h: (h, 0, 0),
                                pipeline_mode=pl.Buffered(w13_buffers))
    else:
        w13_spec = pl.BlockSpec((None, Dp, two_hn), lambda i, h: (h, 0, 0))

    # Advisory cost for XLA's scheduler around the custom call.
    num_m_tiles = Mp // tm_eff
    cost = pl.CostEstimate(
        flops=int(6 * Mp * Dp * Hp),
        transcendentals=int(Mp * Hp),
        bytes_accessed=int(Mp * Dp * (xb + ob)
                           + num_m_tiles * (hb * Dp * two_hn + Hp * Dp) * wb),
    )

    out = pl.pallas_call(
        _ffn_kernel,
        out_shape=jax.ShapeDtypeStruct((Mp, Dp), x.dtype),
        grid_spec=pltpu.PrefetchScalarGridSpec(
            num_scalar_prefetch=0,
            grid=grid,
            in_specs=[
                pl.BlockSpec((tm_eff, Dp), lambda i, h: (i, 0)),
                w13_spec,
                pl.BlockSpec((hn, Dp), lambda i, h: (h, 0)),
            ],
            out_specs=pl.BlockSpec((tm_eff, Dp), lambda i, h: (i, 0)),
            scratch_shapes=[pltpu.VMEM((tm_eff, Dp), jnp.float32)],
        ),
        compiler_params=pltpu.CompilerParams(
            dimension_semantics=("parallel", "arbitrary"),
            vmem_limit_bytes=vmem_limit,
        ),
        cost_estimate=cost,
    )(xm, w13, w2t)

    if needs_pad:
        out = out[:M, :D]
    return out.reshape(B, S, D)


def _hidden_dim(dim, hidden_dim, multiple_of, ffn_dim_multiplier):
    hidden_dim = int(2 * hidden_dim / 3)
    if ffn_dim_multiplier is not None:
        hidden_dim = int(ffn_dim_multiplier * hidden_dim)
    hidden_dim = multiple_of * ((hidden_dim + multiple_of - 1) // multiple_of)
    return hidden_dim


if __name__ == "__main__":
    # Small shapes consistent with the module.
    batch, seq, dim = 2, 8, 64
    hidden_dim_arg, multiple_of, ffn_dim_multiplier = 256, 32, None
    H = _hidden_dim(dim, hidden_dim_arg, multiple_of, ffn_dim_multiplier)  # 192

    key = jax.random.PRNGKey(0)
    kx, k1, k2, k3 = jax.random.split(key, 4)
    x = jax.random.normal(kx, (batch, seq, dim), dtype=jnp.float32)
    # Deterministic parameters in torch nn.Linear weight layout (out, in).
    w1 = jax.random.normal(k1, (H, dim), dtype=jnp.float32) * 0.02
    w2 = jax.random.normal(k2, (dim, H), dtype=jnp.float32) * 0.02
    w3 = jax.random.normal(k3, (H, dim), dtype=jnp.float32) * 0.02

    # Pure-JAX reference.
    ref = (jax.nn.silu(x @ w1.T) * (x @ w3.T)) @ w2.T

    # 1) f32 compute, generation-default tiles (tm clamps to the tiny M).
    w13_f32, w2t_f32 = prepare_weights(w1, w2, w3)
    out = feed_forward(x, w13_f32, w2t_f32)
    jax.block_until_ready(out)
    assert out.shape == (batch, seq, dim)
    assert jnp.allclose(out, ref, atol=1e-5, rtol=1e-4)

    # 2) f32 compute, small tiles to exercise the multi-block (M x H) grid and
    #    the accumulator init/finalize path across hidden blocks.
    w13_small, w2t_small = prepare_weights(w1, w2, w3, hn=128)
    out2 = feed_forward(x, w13_small, w2t_small, tm=8)
    jax.block_until_ready(out2)
    assert jnp.allclose(out2, ref, atol=1e-5, rtol=1e-4)

    # 3) bf16 weights on the MXU (production recipe), f32 accumulation + gate;
    #    x stays f32 in HBM and is cast inside the kernel.
    w13_bf16, w2t_bf16 = prepare_weights(w1, w2, w3,
                                         compute_dtype=jnp.bfloat16)
    out3 = feed_forward(x, w13_bf16, w2t_bf16)
    jax.block_until_ready(out3)
    assert jnp.allclose(out3, ref, atol=1e-2, rtol=5e-2)

    print("KERNEL_OK")
</pallas_src>

<mosaic_0001>
module attributes {stable_mosaic.version = 11 : i64} {
  func.func @_ffn_kernel(%arg0: i32, %arg1: i32, %arg2: memref<16x128xf32, #tpu.memory_space<vmem>>, %arg3: memref<1x128x512xf32, #tpu.memory_space<vmem>>, %arg4: memref<256x128xf32, #tpu.memory_space<vmem>>, %arg5: memref<16x128xf32, #tpu.memory_space<vmem>>, %arg6: memref<16x128xf32, #tpu.memory_space<vmem>>) attributes {dimension_semantics = [#tpu.dimension_semantics<parallel>, #tpu.dimension_semantics<arbitrary>], iteration_bounds = array<i64: 1, 1>, scalar_prefetch = 0 : i64, scratch_operands = 1 : i64, tpu.core_type = #tpu.core_type<tc>, window_params = [{transform_indices = @transform_0, window_bounds = array<i64: 16, 128>}, {transform_indices = @transform_1, window_bounds = array<i64: 1, 128, 512>}, {transform_indices = @transform_2, window_bounds = array<i64: 256, 128>}, {transform_indices = @transform_3, window_bounds = array<i64: 16, 128>}]} {
    %c0_i32 = arith.constant 0 : i32
    %0 = arith.cmpi eq, %arg1, %c0_i32 : i32
    %1 = arith.extui %0 : i1 to i32
    %c0_i32_0 = arith.constant 0 : i32
    %2 = arith.cmpi ne, %1, %c0_i32_0 : i32
    scf.if %2 {
      %cst_15 = arith.constant 0.000000e+00 : f32
      %24 = vector.broadcast %cst_15 : f32 to vector<16x128xf32>
      %c0_16 = arith.constant 0 : index
      %c0_17 = arith.constant 0 : index
      %25 = vector.load %arg6[%c0_16, %c0_17] : memref<16x128xf32, #tpu.memory_space<vmem>>, vector<16x128xf32>
      tpu.vector_store %arg6[%c0_16, %c0_17], %24 {strides = array<i32>} : memref<16x128xf32, #tpu.memory_space<vmem>>, vector<16x128xf32>,
    } else {
    }
    %c0 = arith.constant 0 : index
    %c0_1 = arith.constant 0 : index
    %3 = vector.load %arg2[%c0, %c0_1] : memref<16x128xf32, #tpu.memory_space<vmem>>, vector<16x128xf32>
    %c0_2 = arith.constant 0 : index
    %c0_3 = arith.constant 0 : index
    %c0_4 = arith.constant 0 : index
    %4 = vector.load %arg3[%c0_2, %c0_3, %c0_4] : memref<1x128x512xf32, #tpu.memory_space<vmem>>, vector<1x128x512xf32>
    %5 = vector.shape_cast %4 : vector<1x128x512xf32> to vector<128x512xf32>
    %cst = arith.constant dense<0.000000e+00> : vector<16x512xf32>
    %6 = tpu.matmul %3, %5, %cst {dimension_numbers = #tpu.dot_dimension_numbers<[1], [0], [0], [1], [0, 0, 1, 1], [], []>} : vector<16x128xf32>, vector<128x512xf32>, vector<16x512xf32> -> vector<16x512xf32>
    %7 = vector.extract_strided_slice %6 {offsets = [0, 0], sizes = [16, 256], strides = [1, 1]} : vector<16x512xf32> to vector<16x256xf32>
    %8 = vector.extract_strided_slice %6 {offsets = [0, 256], sizes = [16, 256], strides = [1, 1]} : vector<16x512xf32> to vector<16x256xf32>
    %9 = arith.negf %7 : vector<16x256xf32>
    %10 = math.exp %9 : vector<16x256xf32>
    %cst_5 = arith.constant 1.000000e+00 : f32
    %11 = vector.broadcast %cst_5 : f32 to vector<16x256xf32>
    %12 = arith.addf %11, %10 : vector<16x256xf32>
    %13 = arith.divf %11, %12 : vector<16x256xf32>
    %14 = arith.mulf %7, %13 : vector<16x256xf32>
    %15 = arith.mulf %14, %8 : vector<16x256xf32>
    %c0_6 = arith.constant 0 : index
    %c0_7 = arith.constant 0 : index
    %16 = vector.load %arg6[%c0_6, %c0_7] : memref<16x128xf32, #tpu.memory_space<vmem>>, vector<16x128xf32>
    %c0_8 = arith.constant 0 : index
    %c0_9 = arith.constant 0 : index
    %17 = vector.load %arg4[%c0_8, %c0_9] : memref<256x128xf32, #tpu.memory_space<vmem>>, vector<256x128xf32>
    %cst_10 = arith.constant dense<0.000000e+00> : vector<16x128xf32>
    %18 = tpu.matmul %15, %17, %cst_10 {dimension_numbers = #tpu.dot_dimension_numbers<[1], [0], [0], [1], [0, 0, 1, 1], [], []>} : vector<16x256xf32>, vector<256x128xf32>, vector<16x128xf32> -> vector<16x128xf32>
    %19 = arith.addf %16, %18 : vector<16x128xf32>
    %c0_11 = arith.constant 0 : index
    %c0_12 = arith.constant 0 : index
    %20 = vector.load %arg6[%c0_11, %c0_12] : memref<16x128xf32, #tpu.memory_space<vmem>>, vector<16x128xf32>
    tpu.vector_store %arg6[%c0_11, %c0_12], %19 {strides = array<i32>} : memref<16x128xf32, #tpu.memory_space<vmem>>, vector<16x128xf32>,
    %c0_i32_13 = arith.constant 0 : i32
    %21 = arith.cmpi eq, %arg1, %c0_i32_13 : i32
    %22 = arith.extui %21 : i1 to i32
    %c0_i32_14 = arith.constant 0 : i32
    %23 = arith.cmpi ne, %22, %c0_i32_14 : i32
    scf.if %23 {
      %c0_15 = arith.constant 0 : index
      %c0_16 = arith.constant 0 : index
      %24 = vector.load %arg6[%c0_15, %c0_16] : memref<16x128xf32, #tpu.memory_space<vmem>>, vector<16x128xf32>
      %c0_17 = arith.constant 0 : index
      %c0_18 = arith.constant 0 : index
      %25 = vector.load %arg5[%c0_17, %c0_18] : memref<16x128xf32, #tpu.memory_space<vmem>>, vector<16x128xf32>
      tpu.vector_store %arg5[%c0_17, %c0_18], %24 {strides = array<i32>} : memref<16x128xf32, #tpu.memory_space<vmem>>, vector<16x128xf32>,
    } else {
    }
    return
  }
  func.func @transform_0(%arg0: i32, %arg1: i32) -> (i32, i32) {
    %c0_i32 = arith.constant 0 : i32
    %c0_i32_0 = arith.constant 0 : i32
    return %arg0, %c0_i32 : i32, i32
  }
  func.func @transform_1(%arg0: i32, %arg1: i32) -> (i32, i32, i32) {
    %c0_i32 = arith.constant 0 : i32
    %c0_i32_0 = arith.constant 0 : i32
    %c0_i32_1 = arith.constant 0 : i32
    return %arg1, %c0_i32, %c0_i32_0 : i32, i32, i32
  }
  func.func @transform_2(%arg0: i32, %arg1: i32) -> (i32, i32) {
    %c0_i32 = arith.constant 0 : i32
    %c0_i32_0 = arith.constant 0 : i32
    return %arg1, %c0_i32 : i32, i32
  }
  func.func @transform_3(%arg0: i32, %arg1: i32) -> (i32, i32) {
    %c0_i32 = arith.constant 0 : i32
    %c0_i32_0 = arith.constant 0 : i32
    return %arg0, %c0_i32 : i32, i32
  }
}

</mosaic_0001>

<bundles_post_ra>
// kernel: feed_forward.1
= control target key start
LH: loop header
LB: loop body
LE: loop exit
PB: predicated region body
PF: predicated region fallthrough
CT: control target
= control target key end

     0   :  { %8 = vsyncpa [#allocation4], 0  ;;  %s561_s0 = inlined_call_operand.vmem [shape: f32[16,128], index: 0, kind: input, shape index: {}]   ;;  %s562_s1 = inlined_call_operand.hbm [shape: f32[1,128,512], index: 1, kind: input, shape index: {}]   ;;  %s563_s2 = inlined_call_operand.hbm [shape: f32[256,128], index: 2, kind: input, shape index: {}]   ;;  %s564_s3 = inlined_call_operand.vmem [shape: f32[16,128], index: 3, kind: output, shape index: {}]  }
   0x1   :  { %s16_s14 = sshll.u32 %s562_s1, 4  ;;  %s17_s14 = int_to_ptr.hbm [resolvable:$true] %s16_s14 }
   0x2   :  { %9 = vsyncpa [#allocation6], 0  ;;  %s501_s15 = smov [#allocation3]   ;;  %s29_s19 = sshll.u32 %s563_s2, 4  ;;  %s30_s19 = int_to_ptr.hbm [resolvable:$true] %s29_s19 }
   0x3   :  { %s18_s16 = sshll.u32 %s501_s15, 4  ;;  %s502_s20 = smov 512   ;;  %s19_s16 = int_to_ptr.vmem [resolvable:$true] %s18_s16 }
   0x4   :  { %s503_s21 = smov 32   ;;  %s504_s22 = smov [#allocation5]  }
   0x5   :  { %24 = dma.hbm_to_vmem [thread:$0]  %s17_s14, 8192, %s19_s16, [#allocation4], %s502_s20, %s502_s20, %s503_s21  }
   0x6   :  { %s31_s23 = sshll.u32 %s504_s22, 4  ;;  %s505_s24 = smov 128   ;;  %s32_s23 = int_to_ptr.vmem [resolvable:$true] %s31_s23 }
   0x7   :  { %s506_s25 = smov 8  }
   0x8   :  { %37 = dma.hbm_to_vmem [thread:$0]  %s30_s19, 4096, %s32_s23, [#allocation6], %s505_s24, %s505_s24, %s506_s25  }
   0x9   :  { %497 = dma.done.wait [#allocation4], 8192  }
   0xa   :  { %498 = vsyncadd [#allocation4], 4294959104 }
   0xb   :  { %499 = dma.done.wait [#allocation6], 4096  }
   0xc   :  { %500 = vsyncadd [#allocation6], 4294963200  ;;  %v114_v0 = vld [vmem:[#allocation3 + $0x1e0] sm:$0xff]  ;;  %v115_v1 = vld [vmem:[#allocation3 + $0x1e8] sm:$0xff] }
   0xd   :  { %v110_v2 = vld [vmem:[#allocation3 + $0x1c0] sm:$0xff]  ;;  %118 = vmatpush.msra.mxu0 %v114_v0  ;;  %141 = vmatpush.msra.mxu1 %v115_v1  ;;  %v111_v3 = vld [vmem:[#allocation3 + $0x1c8] sm:$0xff]  ;;  %v116_v12 = vld [vmem:[#allocation3 + $0x1f0] sm:$0xff] }
   0xe   :  { %v106_v4 = vld [vmem:[#allocation3 + $0x1a0] sm:$0xff]  ;;  %v107_v5 = vld [vmem:[#allocation3 + $0x1a8] sm:$0xff]  ;;  %v117_v14 = vld [vmem:[#allocation3 + $0x1f8] sm:$0xff]  ;;  %164 = vmatpush.msra.mxu2 %v116_v12 }
   0xf   :  { %119 = vmatpush.msra.mxu0 %v110_v2  ;;  %142 = vmatpush.msra.mxu1 %v111_v3  ;;  %v102_v6 = vld [vmem:[#allocation3 + $0x180] sm:$0xff]  ;;  %v103_v7 = vld [vmem:[#allocation3 + $0x188] sm:$0xff]  ;;  %v112_v16 = vld [vmem:[#allocation3 + $0x1d0] sm:$0xff] }
  0x10   :  { %v98_v8 = vld [vmem:[#allocation3 + $0x160] sm:$0xff]  ;;  %v99_v9 = vld [vmem:[#allocation3 + $0x168] sm:$0xff]  ;;  %187 = vmatpush.msra.mxu3 %v117_v14  ;;  %v113_v17 = vld [vmem:[#allocation3 + $0x1d8] sm:$0xff]  ;;  %165 = vmatpush.msra.mxu2 %v112_v16 }
  0x11   :  { %120 = vmatpush.msra.mxu0 %v106_v4  ;;  %143 = vmatpush.msra.mxu1 %v107_v5  ;;  %v94_v10 = vld [vmem:[#allocation3 + $0x140] sm:$0xff]  ;;  %v95_v11 = vld [vmem:[#allocation3 + $0x148] sm:$0xff]  ;;  %v108_v18 = vld [vmem:[#allocation3 + $0x1b0] sm:$0xff] }
  0x12   :  { %v90_v13 = vld [vmem:[#allocation3 + $0x120] sm:$0xff]  ;;  %v91_v15 = vld [vmem:[#allocation3 + $0x128] sm:$0xff]  ;;  %v109_v19 = vld [vmem:[#allocation3 + $0x1b8] sm:$0xff]  ;;  %188 = vmatpush.msra.mxu3 %v113_v17  ;;  %166 = vmatpush.msra.mxu2 %v108_v18 }
  0x13   :  { %121 = vmatpush.msra.mxu0 %v102_v6  ;;  %144 = vmatpush.msra.mxu1 %v103_v7  ;;  %v86_v20 = vld [vmem:[#allocation3 + $0x100] sm:$0xff]  ;;  %v87_v21 = vld [vmem:[#allocation3 + $0x108] sm:$0xff]  ;;  %v104_v22 = vld [vmem:[#allocation3 + $0x190] sm:$0xff] }
  0x14   :  { %v105_v23 = vld [vmem:[#allocation3 + $0x198] sm:$0xff]  ;;  %v82_v24 = vld [vmem:[#allocation3 + $0xe0] sm:$0xff]  ;;  %v83_v25 = vld [vmem:[#allocation3 + $0xe8] sm:$0xff]  ;;  %189 = vmatpush.msra.mxu3 %v109_v19  ;;  %167 = vmatpush.msra.mxu2 %v104_v22 }
  0x15   :  { %122 = vmatpush.msra.mxu0 %v98_v8  ;;  %145 = vmatpush.msra.mxu1 %v99_v9  ;;  %v100_v26 = vld [vmem:[#allocation3 + $0x170] sm:$0xff]  ;;  %v101_v27 = vld [vmem:[#allocation3 + $0x178] sm:$0xff]  ;;  %v78_v28 = vld [vmem:[#allocation3 + $0xc0] sm:$0xff] }
  0x16   :  { %v79_v29 = vld [vmem:[#allocation3 + $0xc8] sm:$0xff]  ;;  %190 = vmatpush.msra.mxu3 %v105_v23  ;;  %v96_v30 = vld [vmem:[#allocation3 + $0x150] sm:$0xff]  ;;  %v97_v31 = vld [vmem:[#allocation3 + $0x158] sm:$0xff]  ;;  %168 = vmatpush.msra.mxu2 %v100_v26 }
  0x17   :  { %123 = vmatpush.msra.mxu0 %v94_v10  ;;  %146 = vmatpush.msra.mxu1 %v95_v11  ;;  %v74_v32 = vld [vmem:[#allocation3 + $0xa0] sm:$0xff]  ;;  %v75_v33 = vld [vmem:[#allocation3 + $0xa8] sm:$0xff]  ;;  %v92_v34 = vld [vmem:[#allocation3 + $0x130] sm:$0xff] }
  0x18   :  { %191 = vmatpush.msra.mxu3 %v101_v27  ;;  %v93_v35 = vld [vmem:[#allocation3 + $0x138] sm:$0xff]  ;;  %v70_v36 = vld [vmem:[#allocation3 + $0x80] sm:$0xff]  ;;  %v71_v37 = vld [vmem:[#allocation3 + $0x88] sm:$0xff]  ;;  %169 = vmatpush.msra.mxu2 %v96_v30 }
  0x19   :  { %124 = vmatpush.msra.mxu0 %v90_v13  ;;  %147 = vmatpush.msra.mxu1 %v91_v15  ;;  %v88_v38 = vld [vmem:[#allocation3 + $0x110] sm:$0xff]  ;;  %v89_v39 = vld [vmem:[#allocation3 + $0x118] sm:$0xff]  ;;  %v66_v40 = vld [vmem:[#allocation3 + $0x60] sm:$0xff] }
  0x1a   :  { %192 = vmatpush.msra.mxu3 %v97_v31  ;;  %v67_v41 = vld [vmem:[#allocation3 + $0x68] sm:$0xff]  ;;  %170 = vmatpush.msra.mxu2 %v92_v34  ;;  %v84_v42 = vld [vmem:[#allocation3 + $0xf0] sm:$0xff]  ;;  %v85_v43 = vld [vmem:[#allocation3 + $0xf8] sm:$0xff] }
  0x1b   :  { %125 = vmatpush.msra.mxu0 %v86_v20  ;;  %148 = vmatpush.msra.mxu1 %v87_v21  ;;  %v62_v44 = vld [vmem:[#allocation3 + $0x40] sm:$0xff]  ;;  %v63_v45 = vld [vmem:[#allocation3 + $0x48] sm:$0xff]  ;;  %v80_v46 = vld [vmem:[#allocation3 + $0xd0] sm:$0xff] }
  0x1c   :  { %193 = vmatpush.msra.mxu3 %v93_v35  ;;  %171 = vmatpush.msra.mxu2 %v88_v38  ;;  %v81_v47 = vld [vmem:[#allocation3 + $0xd8] sm:$0xff]  ;;  %v58_v48 = vld [vmem:[#allocation3 + $0x20] sm:$0xff]  ;;  %v59_v49 = vld [vmem:[#allocation3 + $0x28] sm:$0xff] }
  0x1d   :  { %126 = vmatpush.msra.mxu0 %v82_v24  ;;  %149 = vmatpush.msra.mxu1 %v83_v25  ;;  %v76_v50 = vld [vmem:[#allocation3 + $0xb0] sm:$0xff]  ;;  %v77_v51 = vld [vmem:[#allocation3 + $0xb8] sm:$0xff]  ;;  %v54_v52 = vld [vmem:[#allocation3] sm:$0xff] }
  0x1e   :  { %194 = vmatpush.msra.mxu3 %v89_v39  ;;  %172 = vmatpush.msra.mxu2 %v84_v42  ;;  %v55_v53 = vld [vmem:[#allocation3 + $0x8] sm:$0xff]  ;;  %v52_v54 = vld [vmem:[%s561_s0] sm:$0xff]  ;;  %v72_v55 = vld [vmem:[#allocation3 + $0x90] sm:$0xff] }
  0x1f   :  { %127 = vmatpush.msra.mxu0 %v78_v28  ;;  %150 = vmatpush.msra.mxu1 %v79_v29  ;;  %v73_v56 = vld [vmem:[#allocation3 + $0x98] sm:$0xff]  ;;  %v68_v57 = vld [vmem:[#allocation3 + $0x70] sm:$0xff]  ;;  %v53_v63 = vld [vmem:[%s561_s0 + $0x8] sm:$0xff] }
  0x20   :  { %195 = vmatpush.msra.mxu3 %v85_v43  ;;  %173 = vmatpush.msra.mxu2 %v80_v46  ;;  %v69_v58 = vld [vmem:[#allocation3 + $0x78] sm:$0xff]  ;;  %v64_v59 = vld [vmem:[#allocation3 + $0x50] sm:$0xff]  ;;  %v309_v6 = vld [vmem:[#allocation5 + $0x68] sm:$0xff] }
  0x21   :  { %128 = vmatpush.msra.mxu0 %v74_v32  ;;  %151 = vmatpush.msra.mxu1 %v75_v33  ;;  %v65_v60 = vld [vmem:[#allocation3 + $0x58] sm:$0xff]  ;;  %v60_v61 = vld [vmem:[#allocation3 + $0x30] sm:$0xff]  ;;  %v325_v7 = vld [vmem:[#allocation5 + $0xe8] sm:$0xff] }
  0x22   :  { %196 = vmatpush.msra.mxu3 %v81_v47  ;;  %174 = vmatpush.msra.mxu2 %v76_v50  ;;  %v61_v62 = vld [vmem:[#allocation3 + $0x38] sm:$0xff]  ;;  %v56_v0 = vld [vmem:[#allocation3 + $0x10] sm:$0xff]  ;;  %v308_v8 = vld [vmem:[#allocation5 + $0x60] sm:$0xff] }
  0x23   :  { %129 = vmatpush.msra.mxu0 %v70_v36  ;;  %152 = vmatpush.msra.mxu1 %v71_v37  ;;  %v57_v1 = vld [vmem:[#allocation3 + $0x18] sm:$0xff]  ;;  %v310_v4 = vld [vmem:[#allocation5 + $0x70] sm:$0xff]  ;;  %v324_v9 = vld [vmem:[#allocation5 + $0xe0] sm:$0xff] }
  0x24   :  { %197 = vmatpush.msra.mxu3 %v77_v51  ;;  %175 = vmatpush.msra.mxu2 %v72_v55  ;;  %v311_v2 = vld [vmem:[#allocation5 + $0x78] sm:$0xff]  ;;  %v326_v5 = vld [vmem:[#allocation5 + $0xf0] sm:$0xff]  ;;  %v305_v14 = vld [vmem:[#allocation5 + $0x48] sm:$0xff] }
  0x25   :  { %130 = vmatpush.msra.mxu0 %v66_v40  ;;  %153 = vmatpush.msra.mxu1 %v67_v41  ;;  %v327_v3 = vld [vmem:[#allocation5 + $0xf8] sm:$0xff]  ;;  %v306_v12 = vld [vmem:[#allocation5 + $0x50] sm:$0xff]  ;;  %v321_v15 = vld [vmem:[#allocation5 + $0xc8] sm:$0xff] }
  0x26   :  { %198 = vmatpush.msra.mxu3 %v73_v56  ;;  %176 = vmatpush.msra.mxu2 %v68_v57  ;;  %v307_v10 = vld [vmem:[#allocation5 + $0x58] sm:$0xff]  ;;  %v322_v13 = vld [vmem:[#allocation5 + $0xd0] sm:$0xff]  ;;  %v304_v16 = vld [vmem:[#allocation5 + $0x40] sm:$0xff] }
  0x27   :  { %131 = vmatpush.msra.mxu0 %v62_v44  ;;  %154 = vmatpush.msra.mxu1 %v63_v45  ;;  %v323_v11 = vld [vmem:[#allocation5 + $0xd8] sm:$0xff]  ;;  %v320_v17 = vld [vmem:[#allocation5 + $0xc0] sm:$0xff]  ;;  %v302_v20 = vld [vmem:[#allocation5 + $0x30] sm:$0xff] }
  0x28   :  { %199 = vmatpush.msra.mxu3 %v69_v58  ;;  %177 = vmatpush.msra.mxu2 %v64_v59  ;;  %v303_v18 = vld [vmem:[#allocation5 + $0x38] sm:$0xff]  ;;  %v318_v21 = vld [vmem:[#allocation5 + $0xb0] sm:$0xff]  ;;  %v301_v22 = vld [vmem:[#allocation5 + $0x28] sm:$0xff] }
  0x29   :  { %132 = vmatpush.msra.mxu0 %v58_v48  ;;  %155 = vmatpush.msra.mxu1 %v59_v49  ;;  %v319_v19 = vld [vmem:[#allocation5 + $0xb8] sm:$0xff]  ;;  %v317_v23 = vld [vmem:[#allocation5 + $0xa8] sm:$0xff]  ;;  %v300_v24 = vld [vmem:[#allocation5 + $0x20] sm:$0xff] }
  0x2a   :  { %200 = vmatpush.msra.mxu3 %v65_v60  ;;  %178 = vmatpush.msra.mxu2 %v60_v61  ;;  %v316_v25 = vld [vmem:[#allocation5 + $0xa0] sm:$0xff]  ;;  %v299_v26 = vld [vmem:[#allocation5 + $0x18] sm:$0xff]  ;;  %v298_v28 = vld [vmem:[#allocation5 + $0x10] sm:$0xff] }
  0x2b   :  { %133 = vmatpush.msra.mxu0 %v54_v52  ;;  %156 = vmatpush.msra.mxu1 %v55_v53  ;;  %v315_v27 = vld [vmem:[#allocation5 + $0x98] sm:$0xff]  ;;  %v314_v29 = vld [vmem:[#allocation5 + $0x90] sm:$0xff]  ;;  %v297_v34 = vld [vmem:[#allocation5 + $0x8] sm:$0xff] }
  0x2c   :  { %134 = vmatmul.f32.vlgmr.msra.gmra.mxu0 %v52_v54  ;;  %157 = vmatmul.f32.vlgmr.msra.gmra.mxu1 %v52_v54  ;;  %v313_v35 = vld [vmem:[#allocation5 + $0x88] sm:$0xff]  ;;  %v296_v36 = vld [vmem:[#allocation5] sm:$0xff] }
  0x2d   :  { %201 = vmatpush.msra.mxu3 %v61_v62  ;;  %179 = vmatpush.msra.mxu2 %v56_v0  ;;  %v312_v37 = vld [vmem:[#allocation5 + $0x80] sm:$0xff] }
  0x2e   :  { %180 = vmatmul.f32.vlgmr.msra.gmra.mxu2 %v52_v54  ;;  %328 = vmatpush.msrb.mxu0 %v311_v2 }
  0x2f   :  { %202 = vmatpush.msra.mxu3 %v57_v1  ;;  %351 = vmatpush.msrb.mxu1 %v327_v3 }
  0x30   :  { %203 = vmatmul.f32.vlgmr.msra.gmra.mxu3 %v52_v54  ;;  %395 = vmatpush.msrb.mxu2 %v311_v2 }
  0x31   :  { %411 = vmatpush.msrb.mxu3 %v327_v3  ;;  %329 = vmatpush.msrb.mxu0 %v310_v4 }
  0x32   :  { %352 = vmatpush.msrb.mxu1 %v326_v5  ;;  %396 = vmatpush.msrb.mxu2 %v310_v4 }
  0x33   :  { %412 = vmatpush.msrb.mxu3 %v326_v5  ;;  %330 = vmatpush.msrb.mxu0 %v309_v6 }
  0x34   :  { %137 = vmatmul.f32.gmra.mxu0 %v53_v63  ;;  %160 = vmatmul.f32.gmra.mxu1 %v53_v63 }
  0x35   :  { %353 = vmatpush.msrb.mxu1 %v325_v7  ;;  %397 = vmatpush.msrb.mxu2 %v309_v6 }
  0x36   :  { %183 = vmatmul.f32.gmra.mxu2 %v53_v63  ;;  %413 = vmatpush.msrb.mxu3 %v325_v7 }
  0x37   :  { %331 = vmatpush.msrb.mxu0 %v308_v8  ;;  %354 = vmatpush.msrb.mxu1 %v324_v9 }
  0x38   :  { %206 = vmatmul.f32.gmra.mxu3 %v53_v63  ;;  %398 = vmatpush.msrb.mxu2 %v308_v8 }
  0x39   :  { %414 = vmatpush.msrb.mxu3 %v324_v9  ;;  %332 = vmatpush.msrb.mxu0 %v307_v10 }
  0x3a   :  { %355 = vmatpush.msrb.mxu1 %v323_v11  ;;  %399 = vmatpush.msrb.mxu2 %v307_v10 }
  0x3b   :  { %415 = vmatpush.msrb.mxu3 %v323_v11  ;;  %333 = vmatpush.msrb.mxu0 %v306_v12 }
  0x3c   :  { %356 = vmatpush.msrb.mxu1 %v322_v13  ;;  %400 = vmatpush.msrb.mxu2 %v306_v12 }
  0x3d   :  { %416 = vmatpush.msrb.mxu3 %v322_v13  ;;  %334 = vmatpush.msrb.mxu0 %v305_v14 }
  0x3e   :  { %357 = vmatpush.msrb.mxu1 %v321_v15  ;;  %401 = vmatpush.msrb.mxu2 %v305_v14 }
  0x3f   :  { %417 = vmatpush.msrb.mxu3 %v321_v15  ;;  %335 = vmatpush.msrb.mxu0 %v304_v16 }
  0x40   :  { %358 = vmatpush.msrb.mxu1 %v320_v17  ;;  %402 = vmatpush.msrb.mxu2 %v304_v16 }
  0x41   :  { %418 = vmatpush.msrb.mxu3 %v320_v17  ;;  %336 = vmatpush.msrb.mxu0 %v303_v18 }
  0x42   :  { %359 = vmatpush.msrb.mxu1 %v319_v19  ;;  %403 = vmatpush.msrb.mxu2 %v303_v18 }
  0x43   :  { %419 = vmatpush.msrb.mxu3 %v319_v19  ;;  %337 = vmatpush.msrb.mxu0 %v302_v20 }
  0x44   :  { %360 = vmatpush.msrb.mxu1 %v318_v21  ;;  %404 = vmatpush.msrb.mxu2 %v302_v20 }
  0x45   :  { %420 = vmatpush.msrb.mxu3 %v318_v21  ;;  %338 = vmatpush.msrb.mxu0 %v301_v22 }
  0x46   :  { %361 = vmatpush.msrb.mxu1 %v317_v23  ;;  %405 = vmatpush.msrb.mxu2 %v301_v22 }
  0x47   :  { %421 = vmatpush.msrb.mxu3 %v317_v23  ;;  %339 = vmatpush.msrb.mxu0 %v300_v24 }
  0x48   :  { %362 = vmatpush.msrb.mxu1 %v316_v25  ;;  %406 = vmatpush.msrb.mxu2 %v300_v24 }
  0x49   :  { %422 = vmatpush.msrb.mxu3 %v316_v25  ;;  %340 = vmatpush.msrb.mxu0 %v299_v26 }
  0x4a   :  { %363 = vmatpush.msrb.mxu1 %v315_v27  ;;  %407 = vmatpush.msrb.mxu2 %v299_v26 }
  0x4b   :  { %423 = vmatpush.msrb.mxu3 %v315_v27  ;;  %341 = vmatpush.msrb.mxu0 %v298_v28 }
  0x4c   :  { %364 = vmatpush.msrb.mxu1 %v314_v29  ;;  %408 = vmatpush.msrb.mxu2 %v298_v28 }
  0x4d   :  { %424 = vmatpush.msrb.mxu3 %v314_v29  ;;  %342 = vmatpush.msrb.mxu0 %v297_v34 }
  0x4e   :  { %365 = vmatpush.msrb.mxu1 %v313_v35  ;;  %409 = vmatpush.msrb.mxu2 %v297_v34 }
  0x4f   :  { %425 = vmatpush.msrb.mxu3 %v313_v35  ;;  %343 = vmatpush.msrb.mxu0 %v296_v36 }
  0x50   :  { %366 = vmatpush.msrb.mxu1 %v312_v37  ;;  %410 = vmatpush.msrb.mxu2 %v296_v36 }
  0x51   :  { %426 = vmatpush.msrb.mxu3 %v312_v37 }
  0xa9   :  { %v539_v30 = vpop.f32.mrf.mxu0  ;;  %v541_v31 = vpop.f32.mrf.mxu1 }
  0xaa   :  { %v391_v32 = vmul.f32 -1.442695, %v539_v30  ;;  %v392_v33 = vmul.f32 -1.442695, %v541_v31 }
  0xac   :  { %433 = vpow2.f32 %v391_v32 }
  0xad   :  { %435 = vpow2.f32 %v392_v33 }
  0xb1   :  { %v545_v38 = vpop.f32.mrf.mxu0  ;;  %v547_v39 = vpop.f32.mrf.mxu1 }
  0xb2   :  { %v434_v40 = vpop.eup %433  ;;  %v393_v41 = vmul.f32 -1.442695, %v545_v38  ;;  %v394_v44 = vmul.f32 -1.442695, %v547_v39  ;;  %v181_v2 = vpop.f32.mrf.mxu2 }
  0xb3   :  { %v436_v42 = vpop.eup %435  ;;  %v222_v43 = vadd.f32 1.0, %v434_v40  ;;  %v204_v12 = vpop.f32.mrf.mxu3 }
  0xb4   :  { %v223_v45 = vadd.f32 1.0, %v436_v42  ;;  %437 = vpow2.f32 %v393_v41 }
  0xb5   :  { %439 = vrcp.f32 %v222_v43  ;;  %v235_v55 = vand.u32 2147483647, %v222_v43  ;;  %v237_v56 = vand.u32 2147483648, %v222_v43  ;;  %vm231_vm2 = vweird.f32 %v222_v43 }
  0xb6   :  { %441 = vrcp.f32 %v223_v45  ;;  %v252_v59 = vand.u32 2147483648, %v223_v45  ;;  %v250_v61 = vand.u32 2147483647, %v223_v45  ;;  %vm246_vm4 = vweird.f32 %v223_v45 }
  0xb7   :  { %443 = vpow2.f32 %v394_v44  ;;  %v238_v0 = vor.u32 1.1754944e-38, %v237_v56  ;;  %vm236_vm5 = vcmp.eq.f32.partialorder %v235_v55, 8.507059e+37 }
  0xb8   :  { %v253_v4 = vor.u32 1.1754944e-38, %v252_v59  ;;  %vm251_vm7 = vcmp.eq.f32.partialorder %v250_v61, 8.507059e+37 }
  0xba   :  { %v438_v46 = vpop.eup %437  ;;  %v184_v29 = vpop.f32.mrf.mxu2 }
  0xbb   :  { %v440_v47 = vpop.eup %439  ;;  %v224_v48 = vadd.f32 1.0, %v438_v46  ;;  %v207_v35 = vpop.f32.mrf.mxu3 }
  0xbc   :  { %v442_v49 = vpop.eup %441  ;;  %v227_v50 = vmul.f32 %v440_v47, %v222_v43  ;;  %vm232_vm0 = vweird.f32 %v440_v47 }
  0xbd   :  { %v444_v51 = vpop.eup %443  ;;  %v242_v52 = vmul.f32 %v442_v49, %v223_v45  ;;  %445 = vrcp.f32 %v224_v48  ;;  %vm247_vm1 = vweird.f32 %v442_v49  ;;  %vm233_vm3 = vmor %vm231_vm2, %vm232_vm0  ;;  %v267_v14 = vand.u32 2147483648, %v224_v48 }
  0xbe   :  { %v228_v53 = vsub.f32 1.0, %v227_v50  ;;  %v225_v54 = vadd.f32 1.0, %v444_v51  ;;  %vm248_vm6 = vmor %vm246_vm4, %vm247_vm1  ;;  %v265_v17 = vand.u32 2147483647, %v224_v48  ;;  %vm261_vm9 = vweird.f32 %v224_v48 }
  0xbf   :  { %v243_v57 = vsub.f32 1.0, %v242_v52  ;;  %v268_v23 = vor.u32 1.1754944e-38, %v267_v14 }
  0xc0   :  { %v229_v58 = vmul.f32 %v440_v47, %v228_v53  ;;  %447 = vrcp.f32 %v225_v54  ;;  %v282_v22 = vand.u32 2147483648, %v225_v54  ;;  %v280_v25 = vand.u32 2147483647, %v225_v54 }
  0xc1   :  { %v244_v60 = vmul.f32 %v442_v49, %v243_v57  ;;  %vm266_vm12 = vcmp.eq.f32.partialorder %v265_v17, 8.507059e+37  ;;  %vm276_vm13 = vweird.f32 %v225_v54 }
  0xc2   :  { %v230_v62 = vadd.f32 %v440_v47, %v229_v58  ;;  %vm281_vm15 = vcmp.eq.f32.partialorder %v280_v25, 8.507059e+37 }
  0xc3   :  { %v446_v63 = vpop.eup %445  ;;  %v245_v1 = vadd.f32 %v442_v49, %v244_v60 }
  0xc4   :  { %v234_v3 = vsel %vm233_vm3, %v440_v47, %v230_v62  ;;  %v257_v5 = vmul.f32 %v446_v63, %v224_v48  ;;  %vm262_vm8 = vweird.f32 %v446_v63 }
  0xc5   :  { %v239_v6 = vsel %vm236_vm5, %v238_v0, %v234_v3  ;;  %v249_v7 = vsel %vm248_vm6, %v442_v49, %v245_v1  ;;  %vm263_vm10 = vmor %vm261_vm9, %vm262_vm8 }
  0xc6   :  { %v448_v8 = vpop.eup %447  ;;  %v286_v9 = vmul.f32 %v239_v6, %v539_v30  ;;  %v254_v10 = vsel %vm251_vm7, %v253_v4, %v249_v7  ;;  %v258_v11 = vsub.f32 1.0, %v257_v5 }
  0xc7   :  { %v287_v13 = vmul.f32 %v254_v10, %v541_v31  ;;  %v272_v15 = vmul.f32 %v448_v8, %v225_v54  ;;  %vm277_vm11 = vweird.f32 %v448_v8  ;;  %v283_v31 = vor.u32 1.1754944e-38, %v282_v22 }
  0xc8   :  { %v259_v16 = vmul.f32 %v446_v63, %v258_v11  ;;  %v290_v18 = vmul.f32 %v286_v9, %v181_v2  ;;  %vm278_vm14 = vmor %vm276_vm13, %vm277_vm11 }
  0xc9   :  { %v273_v19 = vsub.f32 1.0, %v272_v15  ;;  %v291_v20 = vmul.f32 %v287_v13, %v204_v12 }
  0xca   :  { %v260_v21 = vadd.f32 %v446_v63, %v259_v16  ;;  %344 = vmatmul.f32.vlgmr.msrb.gmra.mxu0 %v290_v18 }
  0xcb   :  { %v274_v24 = vmul.f32 %v448_v8, %v273_v19  ;;  %367 = vmatmul.f32.vlgmr.msrb.gmra.mxu1 %v291_v20 }
  0xcc   :  { %v264_v26 = vsel %vm263_vm10, %v446_v63, %v260_v21 }
  0xcd   :  { %v269_v27 = vsel %vm266_vm12, %v268_v23, %v264_v26  ;;  %v275_v28 = vadd.f32 %v448_v8, %v274_v24 }
  0xce   :  { %v288_v30 = vmul.f32 %v269_v27, %v545_v38 }
  0xcf   :  { %v279_v32 = vsel %vm278_vm14, %v448_v8, %v275_v28 }
  0xd0   :  { %v284_v33 = vsel %vm281_vm15, %v283_v31, %v279_v32  ;;  %v292_v34 = vmul.f32 %v288_v30, %v184_v29 }
  0xd1   :  { %v289_v36 = vmul.f32 %v284_v33, %v547_v39 }
  0xd2   :  { %347 = vmatmul.f32.vlgmr.msrb.gmra.mxu2 %v292_v34 }
  0xd3   :  { %v293_v37 = vmul.f32 %v289_v36, %v207_v35 }
  0xd5   :  { %370 = vmatmul.f32.vlgmr.msrb.gmra.mxu3 %v293_v37 }
 0x147   :  { %v345_v40 = vpop.f32.mrf.mxu0 }
 0x148   :  { %v368_v41 = vpop.f32.mrf.mxu1 }
 0x149   :  { %v369_v42 = vadd.f32 %v368_v41, %v345_v40 }
 0x14b   :  { %383 = vst [vmem:[%s564_s3] sm:$0xff] %v369_v42 }
 0x155   :  { %v348_v38 = vpop.f32.mrf.mxu2 }
 0x158   :  { %v371_v43 = vpop.f32.mrf.mxu3 }
 0x159   :  { %v372_v44 = vadd.f32 %v371_v43, %v348_v38 }
 0x15b   :  { %384 = vst [vmem:[%s564_s3 + $0x8] sm:$0xff] %v372_v44 }
 0x15c   :  { %389 = vsyncpa [#allocation4], 1 }
 0x15d   :  { %390 = vsyncpa [#allocation6], 1 }

</bundles_post_ra>
